<compile_context>
chip_gen: v7x
topology: tpu7x:2x2x1
jax: 0.10.0
libtpu: 0.0.40
codegen_flags: <defaults>
</compile_context>

<pallas_src>
import functools

import jax
import jax.numpy as jnp
from jax.experimental import pallas as pl
from jax.experimental.pallas import tpu as pltpu


def _round_up(x, m):
    return (x + m - 1) // m * m


def _detect_vmem_capacity_bytes():
    try:
        info = pltpu.get_tpu_info()
        cap = getattr(info, "vmem_capacity_bytes", None)
        if cap:
            return int(cap)
    except Exception:
        pass
    return 64 * 1024 * 1024  # conservative fallback (v7x-sized)


_VMEM_CAP_BYTES = _detect_vmem_capacity_bytes()
# Per input, per pipeline buffer: 8 MiB on 128 MiB-VMEM parts (v5e/v6e),
# 4 MiB on 64 MiB-VMEM parts (v7x).
_DEFAULT_BLOCK_BYTES = (8 << 20) if _VMEM_CAP_BYTES >= (100 << 20) else (4 << 20)

# Below this total input size the pallas_call fixed + per-step overhead
# dominates; use the plain XLA fusion instead.
_TINY_INPUT_BYTES = 512 * 1024


def _make_ranking_kernel(n, hw, bn, thw, num_k, compute_dtype):
    """Kernel factory closing over static shapes (static tail handling)."""
    col_ragged = (hw % thw) != 0
    row_ragged = (n % bn) != 0
    tail_valid_cols = hw - (num_k - 1) * thw  # valid lanes in the last HW block
    pinf = float("inf")

    def kernel(pred_ref, true_ref, out_ref, pos_min_ref, neg_max_ref):
        i = pl.program_id(0)   # row-block index ("parallel")
        k = pl.program_id(1)   # HW-block index ("arbitrary", reduction)

        @pl.when(k == 0)
        def _init():
            pos_min_ref[...] = jnp.full_like(pos_min_ref, pinf)
            neg_max_ref[...] = jnp.full_like(neg_max_ref, -pinf)

        p = pred_ref[...]                       # raw logits, native dtype
        if p.dtype != compute_dtype:
            p = p.astype(compute_dtype)
        y = true_ref[...].astype(jnp.float32)   # thresholds compared in f32

        fill_lo = jnp.asarray(pinf, dtype=compute_dtype)
        fill_hi = jnp.asarray(-pinf, dtype=compute_dtype)

        def _accumulate(y_cmp):
            pos_mask = y_cmp > 0.5
            neg_mask = y_cmp < 0.3
            blk_min = jnp.min(jnp.where(pos_mask, p, fill_lo), axis=-1, keepdims=True)
            blk_max = jnp.max(jnp.where(neg_mask, p, fill_hi), axis=-1, keepdims=True)
            pos_min_ref[...] = jnp.minimum(pos_min_ref[...], blk_min)
            neg_max_ref[...] = jnp.maximum(neg_max_ref[...], blk_max)

        def _tail_accumulate():
            # Single select on the label: 0.4 is neither >0.5 nor <0.3, so
            # out-of-range lanes (garbage VMEM) are never classified.
            col = jax.lax.broadcasted_iota(jnp.int32, (1, thw), 1)
            _accumulate(jnp.where(col < tail_valid_cols, y, 0.4))

        if not col_ragged:
            _accumulate(y)                      # hot path, no masking ever
        elif num_k == 1:
            _tail_accumulate()                  # single (ragged) block
        else:
            @pl.when(k < num_k - 1)
            def _hot():
                _accumulate(y)                  # unmasked hot path

            @pl.when(k == num_k - 1)
            def _tail():
                _tail_accumulate()              # masked only on the last block

        @pl.when(k == num_k - 1)
        def _finalize():
            pos_min = pos_min_ref[...].astype(jnp.float32)   # (bn, 1)
            neg_max = neg_max_ref[...].astype(jnp.float32)
            has_pos = pos_min < pinf            # derived from the min (no extra reduce)
            has_neg = neg_max > -pinf
            # sigmoid only on the two per-row scalars (monotonicity).
            vals = jnp.exp(jax.nn.sigmoid(neg_max) - jax.nn.sigmoid(pos_min))
            vals = jnp.where(jnp.logical_and(has_pos, has_neg), vals, 0.0)
            if row_ragged:
                row = jax.lax.broadcasted_iota(jnp.int32, (bn, 1), 0)
                vals = jnp.where(i * bn + row < n, vals, 0.0)
            psum = jnp.sum(vals)                # one cross-lane reduce per row block
            ri = jax.lax.broadcasted_iota(jnp.int32, (8, 128), 0)
            ci = jax.lax.broadcasted_iota(jnp.int32, (8, 128), 1)
            out_ref[...] = jnp.where(jnp.logical_and(ri == 0, ci == 0), psum, 0.0)

    return kernel


@functools.partial(jax.jit, static_argnames=("block_bytes",))
def _ranking_loss_pallas(pred, true, block_bytes=None):
    """Always-Pallas path. `block_bytes` (static) overrides the block budget (tests)."""
    bs, c, h, w = pred.shape
    n = bs * c
    hw = h * w

    p = pred.reshape(n, hw)   # contiguous reshape, no HBM copy
    t = true.reshape(n, hw)

    if block_bytes is None:
        block_bytes = _DEFAULT_BLOCK_BYTES
    itemsize = max(jnp.dtype(pred.dtype).itemsize, jnp.dtype(true.dtype).itemsize)
    budget_elems = max(block_bytes // itemsize, 8 * 128)

    # Lane (HW) tiling: full HW if it fits the budget at >=8 rows, else
    # 128-aligned chunks with a trailing reduction grid axis.
    if hw <= budget_elems // 8:
        thw = hw
    else:
        thw = max(128, (budget_elems // 8) // 128 * 128)
    num_k = pl.cdiv(hw, thw)

    # Row tiling: fill the rest of the budget, multiple of 8, capped at n (padded to 8).
    bn = max(8, min((budget_elems // thw) // 8 * 8, _round_up(n, 8)))
    if n >= 16:
        # Keep >= 2 row blocks so the "parallel" axis can split across v7x's 2 TCs.
        bn = min(bn, _round_up(pl.cdiv(n, 2), 8))
    bn = max(bn, 8)
    num_i = pl.cdiv(n, bn)

    # Native bf16 reductions (selections are bit-exact); everything else in f32.
    if jnp.dtype(pred.dtype) == jnp.dtype(jnp.bfloat16):
        compute_dtype = jnp.bfloat16
    else:
        compute_dtype = jnp.float32

    # VMEM budget from actual usage: 2 inputs x 2 pipeline buffers x padded block
    # (+ small scratch/out), with headroom, never crowding physical VMEM.
    padded_block = _round_up(bn, 16) * _round_up(thw, 128) * itemsize
    vmem_limit = 4 * padded_block + (8 << 20)
    vmem_limit = max(vmem_limit, 32 << 20)
    vmem_limit = min(vmem_limit, _VMEM_CAP_BYTES - (8 << 20))

    kernel = _make_ranking_kernel(n, hw, bn, thw, num_k, compute_dtype)

    out = pl.pallas_call(
        kernel,
        out_shape=jax.ShapeDtypeStruct((num_i * 8, 128), jnp.float32),
        grid=(num_i, num_k),
        in_specs=[
            pl.BlockSpec((bn, thw), lambda i, k: (i, k)),
            pl.BlockSpec((bn, thw), lambda i, k: (i, k)),
        ],
        # One lane-dense (8, 128) partial-sum tile per row block.
        out_specs=pl.BlockSpec((8, 128), lambda i, k: (i, 0)),
        scratch_shapes=[
            pltpu.VMEM((bn, 1), compute_dtype),   # running pos_min (logit space)
            pltpu.VMEM((bn, 1), compute_dtype),   # running neg_max (logit space)
        ],
        compiler_params=pltpu.CompilerParams(
            dimension_semantics=("parallel", "arbitrary"),
            vmem_limit_bytes=int(vmem_limit),
        ),
    )(p, t)

    return jnp.sum(out) / jnp.float32(n)


@jax.jit
def _reference_loss(pred, true):
    """Pure-JAX reference mirroring the PyTorch double loop."""
    bs, c, h, w = pred.shape
    x = jax.nn.sigmoid(pred.astype(jnp.float32)).reshape(bs * c, -1)
    y = true.astype(jnp.float32).reshape(bs * c, -1)
    pos = y > 0.5
    neg = y < 0.3
    pos_min = jnp.min(jnp.where(pos, x, jnp.inf), axis=-1)
    neg_max = jnp.max(jnp.where(neg, x, -jnp.inf), axis=-1)
    vals = jnp.where(jnp.any(pos, axis=-1), jnp.exp(neg_max - pos_min), 0.0)
    return jnp.sum(vals) / (bs * c)


def ranking_loss(pred, true, gamma=1.0):
    """RankingLoss.forward. `gamma` is unused by the reference forward pass."""
    del gamma
    total_bytes = (pred.size * jnp.dtype(pred.dtype).itemsize
                   + true.size * jnp.dtype(true.dtype).itemsize)
    if total_bytes < _TINY_INPUT_BYTES:
        # Tiny problem: XLA fusion beats fixed kernel-launch / per-step overhead.
        return _reference_loss(pred, true)
    return _ranking_loss_pallas(pred, true)


if __name__ == "__main__":
    key = jax.random.PRNGKey(0)
    k1, k2, k3, k4 = jax.random.split(key, 4)

    # 1) Small smoke test straight through the Pallas kernel.
    B, C, H, W = 2, 4, 16, 16
    pred = jax.random.normal(k1, (B, C, H, W), dtype=jnp.float32)
    # true in [0, 1] so both positive (>0.5) and negative (<0.3) pixels exist.
    true = jax.random.uniform(k2, (B, C, H, W), dtype=jnp.float32)

    loss = jax.block_until_ready(_ranking_loss_pallas(pred, true))
    ref = jax.block_until_ready(_reference_loss(pred, true))
    assert jnp.allclose(loss, ref, rtol=1e-5, atol=1e-6), (loss, ref)

    # Public entry point (dispatches to the XLA path at this tiny size).
    loss_pub = jax.block_until_ready(ranking_loss(pred, true, gamma=1.0))
    assert jnp.allclose(loss_pub, ref, rtol=1e-5, atol=1e-6), (loss_pub, ref)

    # 2) Exercise ragged rows + ragged lanes + multi-block HW reduction + bn cap
    #    by forcing a tiny block budget (n=18, hw=169).
    B2, C2, H2, W2 = 3, 6, 13, 13
    pred2 = jax.random.normal(k3, (B2, C2, H2, W2), dtype=jnp.float32)
    true2 = jax.random.uniform(k4, (B2, C2, H2, W2), dtype=jnp.float32)
    loss2 = jax.block_until_ready(_ranking_loss_pallas(pred2, true2, block_bytes=4096))
    ref2 = jax.block_until_ready(_reference_loss(pred2, true2))
    assert jnp.allclose(loss2, ref2, rtol=1e-5, atol=1e-6), (loss2, ref2)

    # 3) bf16 inputs: pred reductions run natively in bf16, label compares in f32.
    pred_bf = pred.astype(jnp.bfloat16)
    true_bf = true.astype(jnp.bfloat16)
    loss3 = jax.block_until_ready(_ranking_loss_pallas(pred_bf, true_bf))
    ref3 = jax.block_until_ready(_reference_loss(pred_bf, true_bf))
    assert jnp.allclose(loss3, ref3, rtol=1e-4, atol=1e-5), (loss3, ref3)

    print("KERNEL_OK")
</pallas_src>

<mosaic_0001>
module attributes {stable_mosaic.version = 11 : i64} {
  func.func @kernel(%arg0: i32, %arg1: i32, %arg2: memref<8x256xf32, #tpu.memory_space<vmem>>, %arg3: memref<8x256xf32, #tpu.memory_space<vmem>>, %arg4: memref<8x128xf32, #tpu.memory_space<vmem>>, %arg5: memref<8x1xf32, #tpu.memory_space<vmem>>, %arg6: memref<8x1xf32, #tpu.memory_space<vmem>>) attributes {dimension_semantics = [#tpu.dimension_semantics<parallel>, #tpu.dimension_semantics<arbitrary>], iteration_bounds = array<i64: 1, 1>, scalar_prefetch = 0 : i64, scratch_operands = 2 : i64, tpu.core_type = #tpu.core_type<tc>, window_params = [{transform_indices = @transform_0, window_bounds = array<i64: 8, 256>}, {transform_indices = @transform_1, window_bounds = array<i64: 8, 256>}, {transform_indices = @transform_2, window_bounds = array<i64: 8, 128>}]} {
    %c0_i32 = arith.constant 0 : i32
    %0 = arith.cmpi eq, %arg1, %c0_i32 : i32
    %1 = arith.extui %0 : i1 to i32
    %c0_i32_0 = arith.constant 0 : i32
    %2 = arith.cmpi ne, %1, %c0_i32_0 : i32
    scf.if %2 {
      %cst_19 = arith.constant 0x7F800000 : f32
      %26 = vector.broadcast %cst_19 : f32 to vector<8x1xf32>
      %c0_20 = arith.constant 0 : index
      %c0_21 = arith.constant 0 : index
      %27 = vector.load %arg5[%c0_20, %c0_21] : memref<8x1xf32, #tpu.memory_space<vmem>>, vector<8x1xf32>
      tpu.vector_store %arg5[%c0_20, %c0_21], %26 {strides = array<i32>} : memref<8x1xf32, #tpu.memory_space<vmem>>, vector<8x1xf32>,
      %cst_22 = arith.constant 0xFF800000 : f32
      %28 = vector.broadcast %cst_22 : f32 to vector<8x1xf32>
      %c0_23 = arith.constant 0 : index
      %c0_24 = arith.constant 0 : index
      %29 = vector.load %arg6[%c0_23, %c0_24] : memref<8x1xf32, #tpu.memory_space<vmem>>, vector<8x1xf32>
      tpu.vector_store %arg6[%c0_23, %c0_24], %28 {strides = array<i32>} : memref<8x1xf32, #tpu.memory_space<vmem>>, vector<8x1xf32>,
    } else {
    }
    %c0 = arith.constant 0 : index
    %c0_1 = arith.constant 0 : index
    %3 = vector.load %arg2[%c0, %c0_1] : memref<8x256xf32, #tpu.memory_space<vmem>>, vector<8x256xf32>
    %c0_2 = arith.constant 0 : index
    %c0_3 = arith.constant 0 : index
    %4 = vector.load %arg3[%c0_2, %c0_3] : memref<8x256xf32, #tpu.memory_space<vmem>>, vector<8x256xf32>
    %cst = arith.constant 5.000000e-01 : f32
    %5 = vector.broadcast %cst : f32 to vector<8x256xf32>
    %6 = arith.cmpf ogt, %4, %5 : vector<8x256xf32>
    %cst_4 = arith.constant 3.000000e-01 : f32
    %7 = vector.broadcast %cst_4 : f32 to vector<8x256xf32>
    %8 = arith.cmpf olt, %4, %7 : vector<8x256xf32>
    %cst_5 = arith.constant 0x7F800000 : f32
    %9 = vector.broadcast %cst_5 : f32 to vector<8x256xf32>
    %10 = arith.select %6, %3, %9 : vector<8x256xi1>, vector<8x256xf32>
    %cst_6 = arith.constant dense<0x7F800000> : vector<8xf32>
    %11 = vector.multi_reduction <minimumf>, %10, %cst_6 [1] : vector<8x256xf32> to vector<8xf32>
    %12 = vector.shape_cast %11 : vector<8xf32> to vector<8x1xf32>
    %cst_7 = arith.constant 0xFF800000 : f32
    %13 = vector.broadcast %cst_7 : f32 to vector<8x256xf32>
    %14 = arith.select %8, %3, %13 : vector<8x256xi1>, vector<8x256xf32>
    %cst_8 = arith.constant dense<0xFF800000> : vector<8xf32>
    %15 = vector.multi_reduction <maximumf>, %14, %cst_8 [1] : vector<8x256xf32> to vector<8xf32>
    %16 = vector.shape_cast %15 : vector<8xf32> to vector<8x1xf32>
    %c0_9 = arith.constant 0 : index
    %c0_10 = arith.constant 0 : index
    %17 = vector.load %arg5[%c0_9, %c0_10] : memref<8x1xf32, #tpu.memory_space<vmem>>, vector<8x1xf32>
    %18 = arith.minimumf %17, %12 : vector<8x1xf32>
    %c0_11 = arith.constant 0 : index
    %c0_12 = arith.constant 0 : index
    %19 = vector.load %arg5[%c0_11, %c0_12] : memref<8x1xf32, #tpu.memory_space<vmem>>, vector<8x1xf32>
    tpu.vector_store %arg5[%c0_11, %c0_12], %18 {strides = array<i32>} : memref<8x1xf32, #tpu.memory_space<vmem>>, vector<8x1xf32>,
    %c0_13 = arith.constant 0 : index
    %c0_14 = arith.constant 0 : index
    %20 = vector.load %arg6[%c0_13, %c0_14] : memref<8x1xf32, #tpu.memory_space<vmem>>, vector<8x1xf32>
    %21 = arith.maximumf %20, %16 : vector<8x1xf32>
    %c0_15 = arith.constant 0 : index
    %c0_16 = arith.constant 0 : index
    %22 = vector.load %arg6[%c0_15, %c0_16] : memref<8x1xf32, #tpu.memory_space<vmem>>, vector<8x1xf32>
    tpu.vector_store %arg6[%c0_15, %c0_16], %21 {strides = array<i32>} : memref<8x1xf32, #tpu.memory_space<vmem>>, vector<8x1xf32>,
    %c0_i32_17 = arith.constant 0 : i32
    %23 = arith.cmpi eq, %arg1, %c0_i32_17 : i32
    %24 = arith.extui %23 : i1 to i32
    %c0_i32_18 = arith.constant 0 : i32
    %25 = arith.cmpi ne, %24, %c0_i32_18 : i32
    scf.if %25 {
      %c0_19 = arith.constant 0 : index
      %c0_20 = arith.constant 0 : index
      %26 = vector.load %arg5[%c0_19, %c0_20] : memref<8x1xf32, #tpu.memory_space<vmem>>, vector<8x1xf32>
      %c0_21 = arith.constant 0 : index
      %c0_22 = arith.constant 0 : index
      %27 = vector.load %arg6[%c0_21, %c0_22] : memref<8x1xf32, #tpu.memory_space<vmem>>, vector<8x1xf32>
      %cst_23 = arith.constant 0x7F800000 : f32
      %28 = vector.broadcast %cst_23 : f32 to vector<8x1xf32>
      %29 = arith.cmpf olt, %26, %28 : vector<8x1xf32>
      %cst_24 = arith.constant 0xFF800000 : f32
      %30 = vector.broadcast %cst_24 : f32 to vector<8x1xf32>
      %31 = arith.cmpf ogt, %27, %30 : vector<8x1xf32>
      %32 = arith.negf %27 : vector<8x1xf32>
      %33 = math.exp %32 : vector<8x1xf32>
      %cst_25 = arith.constant 1.000000e+00 : f32
      %34 = vector.broadcast %cst_25 : f32 to vector<8x1xf32>
      %35 = arith.addf %34, %33 : vector<8x1xf32>
      %36 = arith.divf %34, %35 : vector<8x1xf32>
      %37 = arith.negf %26 : vector<8x1xf32>
      %38 = math.exp %37 : vector<8x1xf32>
      %cst_26 = arith.constant 1.000000e+00 : f32
      %39 = vector.broadcast %cst_26 : f32 to vector<8x1xf32>
      %40 = arith.addf %39, %38 : vector<8x1xf32>
      %41 = arith.divf %39, %40 : vector<8x1xf32>
      %42 = arith.subf %36, %41 : vector<8x1xf32>
      %43 = math.exp %42 : vector<8x1xf32>
      %44 = arith.andi %29, %31 : vector<8x1xi1>
      %cst_27 = arith.constant 0.000000e+00 : f32
      %45 = vector.broadcast %cst_27 : f32 to vector<8x1xf32>
      %46 = arith.select %44, %43, %45 : vector<8x1xi1>, vector<8x1xf32>
      %47 = vector.shape_cast %46 : vector<8x1xf32> to vector<1x8x1xf32>
      %cst_28 = arith.constant dense<0.000000e+00> : vector<1xf32>
      %48 = vector.multi_reduction <add>, %47, %cst_28 [1, 2] : vector<1x8x1xf32> to vector<1xf32>
      %49 = vector.shape_cast %48 : vector<1xf32> to vector<1x1x1xf32>
      %50 = vector.extract %49[0, 0, 0] : f32 from vector<1x1x1xf32>
      %51 = tpu.iota {dimensions = array<i32: 0>} : vector<8x128xi32>
      %52 = tpu.iota {dimensions = array<i32: 1>} : vector<8x128xi32>
      %c0_i32_29 = arith.constant 0 : i32
      %53 = vector.broadcast %c0_i32_29 : i32 to vector<8x128xi32>
      %54 = arith.cmpi eq, %51, %53 : vector<8x128xi32>
      %c0_i32_30 = arith.constant 0 : i32
      %55 = vector.broadcast %c0_i32_30 : i32 to vector<8x128xi32>
      %56 = arith.cmpi eq, %52, %55 : vector<8x128xi32>
      %57 = arith.andi %54, %56 : vector<8x128xi1>
      %cst_31 = arith.constant 0.000000e+00 : f32
      %58 = vector.broadcast %50 : f32 to vector<8x128xf32>
      %59 = vector.broadcast %cst_31 : f32 to vector<8x128xf32>
      %60 = arith.select %57, %58, %59 : vector<8x128xi1>, vector<8x128xf32>
      %c0_32 = arith.constant 0 : index
      %c0_33 = arith.constant 0 : index
      %61 = vector.load %arg4[%c0_32, %c0_33] : memref<8x128xf32, #tpu.memory_space<vmem>>, vector<8x128xf32>
      tpu.vector_store %arg4[%c0_32, %c0_33], %60 {strides = array<i32>} : memref<8x128xf32, #tpu.memory_space<vmem>>, vector<8x128xf32>,
    } else {
    }
    return
  }
  func.func @transform_0(%arg0: i32, %arg1: i32) -> (i32, i32) {
    %c0_i32 = arith.constant 0 : i32
    return %arg0, %arg1 : i32, i32
  }
  func.func @transform_1(%arg0: i32, %arg1: i32) -> (i32, i32) {
    %c0_i32 = arith.constant 0 : i32
    return %arg0, %arg1 : i32, i32
  }
  func.func @transform_2(%arg0: i32, %arg1: i32) -> (i32, i32) {
    %c0_i32 = arith.constant 0 : i32
    %c0_i32_0 = arith.constant 0 : i32
    return %arg0, %c0_i32 : i32, i32
  }
}

</mosaic_0001>

<bundles_post_ra>
// kernel: _ranking_loss_pallas.1
= control target key start
LH: loop header
LB: loop body
LE: loop exit
PB: predicated region body
PF: predicated region fallthrough
CT: control target
= control target key end

     0   :  { %vm15_vm0 = vcmask 7168   ;;  %v107_v3 = vmov inf   ;;  %v108_v11 = vmov -inf   ;;  %v77_v40 = vlaneseq  ;;  %s144_s0 = inlined_call_operand.vmem [shape: f32[8,256], index: 0, kind: input, shape index: {}]   ;;  %s145_s1 = inlined_call_operand.vmem [shape: f32[8,256], index: 1, kind: input, shape index: {}]   ;;  %s146_s2 = inlined_call_operand.vmem [shape: f32[8,128], index: 2, kind: output, shape index: {}]  }
   0x1   :  { %v18_v0 = vld [vmem:[%s144_s0] sm:$0xff]  ;;  %v19_v1 = vld [vmem:[%s144_s0 + $0x8] sm:$0xff]  ;;  %16 = vst.msk [vmem:[#allocation2] sm:$0xff] %vm15_vm0, %v107_v3  ;;  %17 = vst.msk [vmem:[#allocation3] sm:$0xff] %vm15_vm0, %v108_v11 }
   0x2   :  { %v20_v2 = vld [vmem:[%s145_s1] sm:$0xff]  ;;  %v21_v4 = vld [vmem:[%s145_s1 + $0x8] sm:$0xff]  ;;  %v78_v41 = vshrl.u32 %v77_v40, 7  ;;  %v80_v42 = vand.u32 127, %v77_v40 }
   0x3   :  { %vm22_vm1 = vcmp.gt.f32.partialorder %v20_v2, 0.5  ;;  %vm24_vm2 = vcmp.lt.f32.partialorder %v20_v2, 0.3  ;;  %vm23_vm3 = vcmp.gt.f32.partialorder %v21_v4, 0.5  ;;  %vm25_vm4 = vcmp.lt.f32.partialorder %v21_v4, 0.3 }
   0x4   :  { %v26_v5 = vsel %vm22_vm1, %v18_v0, inf  ;;  %v27_v6 = vsel %vm23_vm3, %v19_v1, inf  ;;  %v31_v7 = vsel %vm24_vm2, %v18_v0, -inf  ;;  %v32_v8 = vsel %vm25_vm4, %v19_v1, -inf }
   0x5   :  { %v28_v9 = vmin.f32 %v26_v5, %v27_v6  ;;  %v33_v10 = vmax.f32 %v31_v7, %v32_v8  ;;  %vm81_vm8 = vcmp.eq.s32.totalorder %v78_v41, 0  ;;  %vm82_vm9 = vcmp.eq.s32.totalorder %v80_v42, 0 }
   0x6   :  { %vm83_vm10 = vmand %vm81_vm8, %vm82_vm9 }
   0x7   :  { %29 = vmin.xlane.f32.xlu0 %v28_v9 }
   0x8   :  { %v36_v12 = vld [vmem:[#allocation2] sm:$0xff]  ;;  %v40_v15 = vld [vmem:[#allocation3] sm:$0xff] }
   0xb   :  { %34 = vmax.xlane.f32.xlu0 %v33_v10 }
  0x94   :  { %v30_v13 = vpop.xlane.xlu0 %29 }
  0x95   :  { %v37_v14 = vmin.f32 %v36_v12, %v30_v13 }
  0x97   :  { %39 = vst.msk [vmem:[#allocation2] sm:$0xff] %vm15_vm0, %v37_v14 }
  0x98   :  { %v35_v16 = vpop.xlane.xlu0 %34 }
  0x99   :  { %v41_v17 = vmax.f32 %v40_v15, %v35_v16 }
  0x9b   :  { %42 = vst.msk [vmem:[#allocation3] sm:$0xff] %vm15_vm0, %v41_v17 }
  0x9e   :  { %v46_v18 = vld [vmem:[#allocation2] sm:$0xff] }
  0x9f   :  { %v92_v19 = vmul.f32 -1.442695, %v46_v18  ;;  %vm48_vm6 = vcmp.lt.f32.partialorder %v46_v18, inf }
  0xa1   :  { %97 = vpow2.f32 %v92_v19 }
  0xa2   :  { %v47_v20 = vld [vmem:[#allocation3] sm:$0xff] }
  0xa3   :  { %v91_v21 = vmul.f32 -1.442695, %v47_v20  ;;  %vm49_vm5 = vcmp.gt.f32.partialorder %v47_v20, -inf }
  0xa4   :  { %vm65_vm7 = vmand %vm48_vm6, %vm49_vm5 }
  0xa5   :  { %99 = vpow2.f32 %v91_v21 }
  0xab   :  { %v98_v22 = vpop.eup %97 }
  0xac   :  { %v59_v23 = vadd.f32 1.0, %v98_v22 }
  0xae   :  { %101 = vrcp.f32 %v59_v23 }
  0xaf   :  { %v100_v24 = vpop.eup %99 }
  0xb0   :  { %v53_v25 = vadd.f32 1.0, %v100_v24 }
  0xb2   :  { %103 = vrcp.f32 %v53_v25 }
  0xb8   :  { %v102_v26 = vpop.eup %101 }
  0xbc   :  { %v104_v27 = vpop.eup %103 }
  0xbd   :  { %v62_v28 = vsub.f32 %v104_v27, %v102_v26 }
  0xbf   :  { %v63_v29 = vmul.f32 1.442695, %v62_v28 }
  0xc1   :  { %105 = vpow2.f32 %v63_v29 }
  0xcb   :  { %v106_v30 = vpop.eup %105 }
  0xcc   :  { %v66_v31 = vsel %vm65_vm7, %v106_v30, 0.0 }
  0xcd   :  { %v67_v32 = vsel %vm15_vm0, %v66_v31, 0.0 }
  0xce   :  { %68 = vadd.xlane.f32.xlu1 %v67_v32 }
 0x15b   :  { %v69_v33 = vpop.xlane.xlu1 %68 }
 0x15c   :  { %v70_v34 = vrot.slane %v69_v33, 4 }
 0x15e   :  { %v71_v35 = vadd.f32 %v70_v34, %v69_v33 }
 0x160   :  { %v72_v36 = vrot.slane %v71_v35, 2 }
 0x162   :  { %v73_v37 = vadd.f32 %v72_v36, %v71_v35 }
 0x164   :  { %v74_v38 = vrot.slane %v73_v37, 1 }
 0x166   :  { %v75_v39 = vadd.f32 %v74_v38, %v73_v37 }
 0x168   :  { %93 = vpush %v75_v39 }
 0x199   :  { %s94_s0 = spop %93 }
 0x19a   :  { %v84_v43 = vstv %s94_s0 }
 0x19b   :  { %v85_v44 = vsel %vm83_vm10, %v84_v43, 0.0 }
 0x19c   :  { %86 = vst [vmem:[%s146_s2] sm:$0xff] %v85_v44 }

</bundles_post_ra>
